<compile_context>
chip_gen: v7x
topology: tpu7x:2x2x1
jax: 0.10.0
libtpu: 0.0.40
codegen_flags: <defaults>
</compile_context>

<pallas_src>
import functools

import jax
import jax.numpy as jnp
from jax.experimental import pallas as pl
from jax.experimental.pallas import tpu as pltpu

LANE = 128
_VMEM_LIMIT = 48 * 1024 * 1024   # above default scoped limit, < v7x 64 MiB physical


def _round_up(x, m):
    return ((x + m - 1) // m) * m


def _pad_nodes(n):
    if n <= 512:
        return _round_up(n, LANE)
    return _round_up(n, 512)


def _pick_tiles(n_pad):
    tile_m = 256 if n_pad % 256 == 0 else 128
    for tk in (512, 256, 128):
        if n_pad % tk == 0:
            return tile_m, tk
    return tile_m, 128


# ---------------------------------------------------------------------------
# Kernel A: tiled (A+I) @ H aggregation + MLP + partial BN statistics
# ---------------------------------------------------------------------------
def gin_mlp_kernel(adj_ref, h_ref, w1_ref, b1_ref, w2_ref, b2_ref,
                   z_ref, stats_ref, acc_ref, *, n_valid, tile_m, num_k):
    # program_id must be bound at the kernel's top level (never inside pl.when),
    # otherwise it lands inside a cond-branch jaxpr with no CPU/interpret lowering.
    i = pl.program_id(0)
    k = pl.program_id(1)

    @pl.when(k == 0)
    def _():
        acc_ref[...] = jnp.zeros_like(acc_ref)

    # bf16 adjacency holds exact (small-integer) edge counts -> upcast is exact.
    adj = adj_ref[...].astype(jnp.float32)                       # [TM, TK]
    acc_ref[...] += jnp.dot(adj, h_ref[...],
                            preferred_element_type=jnp.float32)  # [TM, F]

    @pl.when(k == num_k - 1)
    def _():
        agg = acc_ref[...]                                       # [TM, F]
        hdn = jnp.dot(agg, w1_ref[...],
                      preferred_element_type=jnp.float32) + b1_ref[...]
        hdn = jnp.maximum(hdn, 0.0)
        z = jnp.dot(hdn, w2_ref[...],
                    preferred_element_type=jnp.float32) + b2_ref[...]   # [TM, E]
        z_ref[...] = z

        # masked partial BatchNorm stats (exclude padded rows)
        rows = jax.lax.broadcasted_iota(jnp.int32, (tile_m, 1), 0) + i * tile_m
        zm = jnp.where(rows < n_valid, z, 0.0)
        s1 = jnp.sum(zm, axis=0, keepdims=True)                  # [1, E]
        s2 = jnp.sum(zm * zm, axis=0, keepdims=True)             # [1, E]
        stats_ref[...] = jnp.concatenate([s1, s2], axis=0)[None]  # [1, 2, E]


# ---------------------------------------------------------------------------
# Kernel B: BatchNorm finalize (+ optional ReLU), pad rows zeroed
# ---------------------------------------------------------------------------
def bn_relu_kernel(z_ref, stats_ref, gamma_ref, beta_ref, out_ref,
                   *, n_valid, tile_m, apply_relu):
    i = pl.program_id(0)

    s = stats_ref[...]                                           # [Mt, 2, E]
    s1 = jnp.sum(s[:, 0, :], axis=0, keepdims=True)              # [1, E]
    s2 = jnp.sum(s[:, 1, :], axis=0, keepdims=True)              # [1, E]
    inv_n = 1.0 / float(n_valid)
    mean = s1 * inv_n
    var = jnp.maximum(s2 * inv_n - mean * mean, 0.0)             # biased variance
    inv_std = jax.lax.rsqrt(var + 1e-5)

    z = z_ref[...]
    zn = (z - mean) * (inv_std * gamma_ref[...]) + beta_ref[...]
    if apply_relu:
        zn = jnp.maximum(zn, 0.0)

    rows = jax.lax.broadcasted_iota(jnp.int32, (tile_m, 1), 0) + i * tile_m
    out_ref[...] = jnp.where(rows < n_valid, zn, 0.0)


# ---------------------------------------------------------------------------
# One GIN layer = kernel A (tiled) + kernel B (epilogue)
# ---------------------------------------------------------------------------
def gin_layer(adj_bf16, h, w1, b1, w2, b2, gamma, beta, *,
              n_valid, apply_relu, tile_m, tile_k):
    n_pad, f_pad = h.shape
    e_pad = w2.shape[1]
    mt = n_pad // tile_m
    kt = n_pad // tile_k

    kernel_a = functools.partial(gin_mlp_kernel, n_valid=n_valid,
                                 tile_m=tile_m, num_k=kt)
    z, stats = pl.pallas_call(
        kernel_a,
        out_shape=(jax.ShapeDtypeStruct((n_pad, e_pad), jnp.float32),
                   jax.ShapeDtypeStruct((mt, 2, e_pad), jnp.float32)),
        grid=(mt, kt),
        in_specs=[
            pl.BlockSpec((tile_m, tile_k), lambda i, k: (i, k)),   # adj tile
            pl.BlockSpec((tile_k, f_pad), lambda i, k: (k, 0)),    # h strip (K-streamed)
            pl.BlockSpec((f_pad, e_pad), lambda i, k: (0, 0)),     # w1 (resident)
            pl.BlockSpec((1, e_pad), lambda i, k: (0, 0)),         # b1 (resident)
            pl.BlockSpec((e_pad, e_pad), lambda i, k: (0, 0)),     # w2 (resident)
            pl.BlockSpec((1, e_pad), lambda i, k: (0, 0)),         # b2 (resident)
        ],
        out_specs=(
            pl.BlockSpec((tile_m, e_pad), lambda i, k: (i, 0)),    # z per row tile
            pl.BlockSpec((1, 2, e_pad), lambda i, k: (i, 0, 0)),   # partial BN stats
        ),
        scratch_shapes=[pltpu.VMEM((tile_m, f_pad), jnp.float32)],
        compiler_params=pltpu.CompilerParams(
            dimension_semantics=("parallel", "arbitrary"),
            vmem_limit_bytes=_VMEM_LIMIT,
        ),
    )(adj_bf16, h, w1, b1, w2, b2)

    kernel_b = functools.partial(bn_relu_kernel, n_valid=n_valid,
                                 tile_m=tile_m, apply_relu=apply_relu)
    h_out = pl.pallas_call(
        kernel_b,
        out_shape=jax.ShapeDtypeStruct((n_pad, e_pad), jnp.float32),
        grid=(mt,),
        in_specs=[
            pl.BlockSpec((tile_m, e_pad), lambda i: (i, 0)),       # z tile
            pl.BlockSpec((mt, 2, e_pad), lambda i: (0, 0, 0)),     # all partial stats
            pl.BlockSpec((1, e_pad), lambda i: (0, 0)),            # gamma
            pl.BlockSpec((1, e_pad), lambda i: (0, 0)),            # beta
        ],
        out_specs=pl.BlockSpec((tile_m, e_pad), lambda i: (i, 0)),
        compiler_params=pltpu.CompilerParams(
            dimension_semantics=("parallel",),
            vmem_limit_bytes=_VMEM_LIMIT,
        ),
    )(z, stats, gamma, beta)
    return h_out


# ---------------------------------------------------------------------------
# GNN wrapper (glue): parameters, padding, adjacency construction, layer loop
# ---------------------------------------------------------------------------
def init_gnn_params(key, num_layer, win_size, emb_dim):
    """Linear weights stored as [in, out] (transposed vs. PyTorch); semantics identical."""
    params = []
    f_in = win_size
    for _ in range(num_layer):
        key, k1, k2, k3, k4 = jax.random.split(key, 5)
        bound1 = 1.0 / jnp.sqrt(f_in)
        bound2 = 1.0 / jnp.sqrt(emb_dim)
        w1 = jax.random.uniform(k1, (f_in, emb_dim), jnp.float32, -bound1, bound1)
        b1 = jax.random.uniform(k2, (1, emb_dim), jnp.float32, -bound1, bound1)
        w2 = jax.random.uniform(k3, (emb_dim, emb_dim), jnp.float32, -bound2, bound2)
        b2 = jax.random.uniform(k4, (1, emb_dim), jnp.float32, -bound2, bound2)
        gamma = jnp.ones((1, emb_dim), jnp.float32)   # BatchNorm1d weight
        beta = jnp.zeros((1, emb_dim), jnp.float32)   # BatchNorm1d bias
        params.append((w1, b1, w2, b2, gamma, beta))
        f_in = emb_dim
    return params


def gnn_forward(x, edge_index, params, jk="last"):
    n, f_in = x.shape
    emb_dim = params[0][2].shape[0]
    num_layer = len(params)

    n_pad = _pad_nodes(n)
    tile_m, tile_k = _pick_tiles(n_pad)
    e_pad = _round_up(emb_dim, LANE)

    # Dense adjacency with the GIN self-loop folded in: (A + (1+eps)*I), eps = 0.
    src, dst = edge_index[0], edge_index[1]
    adj = jnp.zeros((n_pad, n_pad), jnp.float32)
    adj = adj.at[dst, src].add(1.0)
    idx = jnp.arange(n)
    adj = adj.at[idx, idx].add(1.0)
    adj_bf16 = adj.astype(jnp.bfloat16)     # exact: small-integer edge counts

    f_pad0 = _round_up(f_in, LANE)
    h = jnp.zeros((n_pad, f_pad0), jnp.float32).at[:n, :f_in].set(x)

    h_list = []
    for layer, (w1, b1, w2, b2, gamma, beta) in enumerate(params):
        fi = w1.shape[0]
        f_padl = _round_up(fi, LANE)
        w1p = jnp.zeros((f_padl, e_pad), jnp.float32).at[:fi, :emb_dim].set(w1)
        b1p = jnp.zeros((1, e_pad), jnp.float32).at[:, :emb_dim].set(b1)
        w2p = jnp.zeros((e_pad, e_pad), jnp.float32).at[:emb_dim, :emb_dim].set(w2)
        b2p = jnp.zeros((1, e_pad), jnp.float32).at[:, :emb_dim].set(b2)
        gp = jnp.ones((1, e_pad), jnp.float32).at[:, :emb_dim].set(gamma)
        bp = jnp.zeros((1, e_pad), jnp.float32).at[:, :emb_dim].set(beta)
        apply_relu = layer != num_layer - 1
        h = gin_layer(adj_bf16, h, w1p, b1p, w2p, b2p, gp, bp,
                      n_valid=n, apply_relu=apply_relu,
                      tile_m=tile_m, tile_k=tile_k)
        h_list.append(h)

    outs = [hh[:n, :emb_dim] for hh in h_list]
    if jk == "last":
        return outs[-1]
    elif jk == "sum":
        return jnp.sum(jnp.stack(outs, axis=0), axis=0)
    elif jk == "max":
        return jnp.max(jnp.stack(outs, axis=0), axis=0)
    elif jk == "concat":
        return jnp.concatenate([x] + outs, axis=1)
    raise ValueError(jk)


# Pure-JAX reference for correctness check.
def gnn_forward_ref(x, edge_index, params):
    n = x.shape[0]
    src, dst = edge_index[0], edge_index[1]
    adj = jnp.zeros((n, n), jnp.float32).at[dst, src].add(1.0)
    num_layer = len(params)
    h = x
    for layer, (w1, b1, w2, b2, gamma, beta) in enumerate(params):
        agg = adj @ h + h
        z = jnp.maximum(agg @ w1 + b1, 0.0) @ w2 + b2
        mean = z.mean(0, keepdims=True)
        var = ((z - mean) ** 2).mean(0, keepdims=True)
        z = (z - mean) / jnp.sqrt(var + 1e-5) * gamma + beta
        if layer != num_layer - 1:
            z = jnp.maximum(z, 0.0)
        h = z
    return h


if __name__ == "__main__":
    num_layer = 2
    win_size = 8       # input node-feature dim
    emb_dim = 32       # hidden / output dim
    num_nodes = 16
    num_edges = 32

    key = jax.random.PRNGKey(0)
    kx, ke, kp = jax.random.split(key, 3)

    x = jax.random.normal(kx, (num_nodes, win_size), jnp.float32)
    edge_index = jax.random.randint(ke, (2, num_edges), 0, num_nodes, jnp.int32)
    params = init_gnn_params(kp, num_layer, win_size, emb_dim)

    out = gnn_forward(x, edge_index, params, jk="last")
    out = jax.block_until_ready(out)

    ref = gnn_forward_ref(x, edge_index, params)
    assert out.shape == (num_nodes, emb_dim)
    assert jnp.allclose(out, ref, atol=2e-2, rtol=2e-2), "mismatch vs JAX reference"

    print("KERNEL_OK")
</pallas_src>

<mosaic_0001>
module attributes {stable_mosaic.version = 11 : i64} {
  func.func @gin_mlp_kernel(%arg0: i32, %arg1: i32, %arg2: memref<128x128xbf16, #tpu.memory_space<vmem>>, %arg3: memref<128x128xf32, #tpu.memory_space<vmem>>, %arg4: memref<128x128xf32, #tpu.memory_space<vmem>>, %arg5: memref<1x128xf32, #tpu.memory_space<vmem>>, %arg6: memref<128x128xf32, #tpu.memory_space<vmem>>, %arg7: memref<1x128xf32, #tpu.memory_space<vmem>>, %arg8: memref<128x128xf32, #tpu.memory_space<vmem>>, %arg9: memref<1x2x128xf32, #tpu.memory_space<vmem>>, %arg10: memref<128x128xf32, #tpu.memory_space<vmem>>) attributes {dimension_semantics = [#tpu.dimension_semantics<parallel>, #tpu.dimension_semantics<arbitrary>], iteration_bounds = array<i64: 1, 1>, scalar_prefetch = 0 : i64, scratch_operands = 1 : i64, tpu.core_type = #tpu.core_type<tc>, window_params = [{transform_indices = @transform_0, window_bounds = array<i64: 128, 128>}, {transform_indices = @transform_1, window_bounds = array<i64: 128, 128>}, {pipeline_mode = #tpu.pipeline_mode<synchronous>, transform_indices = @transform_2, window_bounds = array<i64: 128, 128>}, {pipeline_mode = #tpu.pipeline_mode<synchronous>, transform_indices = @transform_3, window_bounds = array<i64: 1, 128>}, {pipeline_mode = #tpu.pipeline_mode<synchronous>, transform_indices = @transform_4, window_bounds = array<i64: 128, 128>}, {pipeline_mode = #tpu.pipeline_mode<synchronous>, transform_indices = @transform_5, window_bounds = array<i64: 1, 128>}, {transform_indices = @transform_6, window_bounds = array<i64: 128, 128>}, {transform_indices = @transform_7, window_bounds = array<i64: 1, 2, 128>}]} {
    %c0_i32 = arith.constant 0 : i32
    %0 = arith.cmpi eq, %arg1, %c0_i32 : i32
    %1 = arith.extui %0 : i1 to i32
    %c0_i32_0 = arith.constant 0 : i32
    %2 = arith.cmpi ne, %1, %c0_i32_0 : i32
    scf.if %2 {
      %cst_10 = arith.constant 0.000000e+00 : f32
      %13 = vector.broadcast %cst_10 : f32 to vector<128x128xf32>
      %c0_11 = arith.constant 0 : index
      %c0_12 = arith.constant 0 : index
      %14 = vector.load %arg10[%c0_11, %c0_12] : memref<128x128xf32, #tpu.memory_space<vmem>>, vector<128x128xf32>
      tpu.vector_store %arg10[%c0_11, %c0_12], %13 {strides = array<i32>} : memref<128x128xf32, #tpu.memory_space<vmem>>, vector<128x128xf32>,
    } else {
    }
    %c0 = arith.constant 0 : index
    %c0_1 = arith.constant 0 : index
    %3 = vector.load %arg2[%c0, %c0_1] : memref<128x128xbf16, #tpu.memory_space<vmem>>, vector<128x128xbf16>
    %4 = arith.extf %3 : vector<128x128xbf16> to vector<128x128xf32>
    %c0_2 = arith.constant 0 : index
    %c0_3 = arith.constant 0 : index
    %5 = vector.load %arg10[%c0_2, %c0_3] : memref<128x128xf32, #tpu.memory_space<vmem>>, vector<128x128xf32>
    %c0_4 = arith.constant 0 : index
    %c0_5 = arith.constant 0 : index
    %6 = vector.load %arg3[%c0_4, %c0_5] : memref<128x128xf32, #tpu.memory_space<vmem>>, vector<128x128xf32>
    %cst = arith.constant dense<0.000000e+00> : vector<128x128xf32>
    %7 = tpu.matmul %4, %6, %cst {dimension_numbers = #tpu.dot_dimension_numbers<[1], [0], [0], [1], [0, 0, 1, 1], [], []>} : vector<128x128xf32>, vector<128x128xf32>, vector<128x128xf32> -> vector<128x128xf32>
    %8 = arith.addf %5, %7 : vector<128x128xf32>
    %c0_6 = arith.constant 0 : index
    %c0_7 = arith.constant 0 : index
    %9 = vector.load %arg10[%c0_6, %c0_7] : memref<128x128xf32, #tpu.memory_space<vmem>>, vector<128x128xf32>
    tpu.vector_store %arg10[%c0_6, %c0_7], %8 {strides = array<i32>} : memref<128x128xf32, #tpu.memory_space<vmem>>, vector<128x128xf32>,
    %c0_i32_8 = arith.constant 0 : i32
    %10 = arith.cmpi eq, %arg1, %c0_i32_8 : i32
    %11 = arith.extui %10 : i1 to i32
    %c0_i32_9 = arith.constant 0 : i32
    %12 = arith.cmpi ne, %11, %c0_i32_9 : i32
    scf.if %12 {
      %c0_10 = arith.constant 0 : index
      %c0_11 = arith.constant 0 : index
      %13 = vector.load %arg10[%c0_10, %c0_11] : memref<128x128xf32, #tpu.memory_space<vmem>>, vector<128x128xf32>
      %c0_12 = arith.constant 0 : index
      %c0_13 = arith.constant 0 : index
      %14 = vector.load %arg4[%c0_12, %c0_13] : memref<128x128xf32, #tpu.memory_space<vmem>>, vector<128x128xf32>
      %cst_14 = arith.constant dense<0.000000e+00> : vector<128x128xf32>
      %15 = tpu.matmul %13, %14, %cst_14 {dimension_numbers = #tpu.dot_dimension_numbers<[1], [0], [0], [1], [0, 0, 1, 1], [], []>} : vector<128x128xf32>, vector<128x128xf32>, vector<128x128xf32> -> vector<128x128xf32>
      %c0_15 = arith.constant 0 : index
      %c0_16 = arith.constant 0 : index
      %16 = vector.load %arg5[%c0_15, %c0_16] : memref<1x128xf32, #tpu.memory_space<vmem>>, vector<1x128xf32>
      %17 = vector.broadcast %16 : vector<1x128xf32> to vector<128x128xf32>
      %18 = arith.addf %15, %17 : vector<128x128xf32>
      %cst_17 = arith.constant 0.000000e+00 : f32
      %19 = vector.broadcast %cst_17 : f32 to vector<128x128xf32>
      %20 = arith.maximumf %18, %19 : vector<128x128xf32>
      %c0_18 = arith.constant 0 : index
      %c0_19 = arith.constant 0 : index
      %21 = vector.load %arg6[%c0_18, %c0_19] : memref<128x128xf32, #tpu.memory_space<vmem>>, vector<128x128xf32>
      %cst_20 = arith.constant dense<0.000000e+00> : vector<128x128xf32>
      %22 = tpu.matmul %20, %21, %cst_20 {dimension_numbers = #tpu.dot_dimension_numbers<[1], [0], [0], [1], [0, 0, 1, 1], [], []>} : vector<128x128xf32>, vector<128x128xf32>, vector<128x128xf32> -> vector<128x128xf32>
      %c0_21 = arith.constant 0 : index
      %c0_22 = arith.constant 0 : index
      %23 = vector.load %arg7[%c0_21, %c0_22] : memref<1x128xf32, #tpu.memory_space<vmem>>, vector<1x128xf32>
      %24 = vector.broadcast %23 : vector<1x128xf32> to vector<128x128xf32>
      %25 = arith.addf %22, %24 : vector<128x128xf32>
      %c0_23 = arith.constant 0 : index
      %c0_24 = arith.constant 0 : index
      %26 = vector.load %arg8[%c0_23, %c0_24] : memref<128x128xf32, #tpu.memory_space<vmem>>, vector<128x128xf32>
      tpu.vector_store %arg8[%c0_23, %c0_24], %25 {strides = array<i32>} : memref<128x128xf32, #tpu.memory_space<vmem>>, vector<128x128xf32>,
      %27 = tpu.iota {dimensions = array<i32: 0>} : vector<128x1xi32>
      %c128_i32 = arith.constant 128 : i32
      %28 = arith.muli %arg0, %c128_i32 : i32
      %29 = vector.broadcast %28 : i32 to vector<128x1xi32>
      %30 = arith.addi %27, %29 : vector<128x1xi32>
      %c16_i32 = arith.constant 16 : i32
      %31 = vector.broadcast %c16_i32 : i32 to vector<128x1xi32>
      %32 = arith.cmpi slt, %30, %31 : vector<128x1xi32>
      %cst_25 = arith.constant 0.000000e+00 : f32
      %33 = vector.shape_cast %32 : vector<128x1xi1> to vector<128x1xi1>
      %34 = vector.broadcast %33 : vector<128x1xi1> to vector<128x128xi1>
      %35 = vector.broadcast %cst_25 : f32 to vector<128x128xf32>
      %36 = arith.select %34, %25, %35 : vector<128x128xi1>, vector<128x128xf32>
      %cst_26 = arith.constant dense<0.000000e+00> : vector<128xf32>
      %37 = vector.multi_reduction <add>, %36, %cst_26 [0] : vector<128x128xf32> to vector<128xf32>
      %38 = vector.shape_cast %37 : vector<128xf32> to vector<1x128xf32>
      %39 = arith.mulf %36, %36 : vector<128x128xf32>
      %cst_27 = arith.constant dense<0.000000e+00> : vector<128xf32>
      %40 = vector.multi_reduction <add>, %39, %cst_27 [0] : vector<128x128xf32> to vector<128xf32>
      %41 = vector.shape_cast %40 : vector<128xf32> to vector<1x128xf32>
      %42 = tpu.concatenate %38, %41 in 0 : vector<1x128xf32>, vector<1x128xf32> -> vector<2x128xf32>
      %43 = vector.shape_cast %42 : vector<2x128xf32> to vector<1x2x128xf32>
      %c0_28 = arith.constant 0 : index
      %c0_29 = arith.constant 0 : index
      %c0_30 = arith.constant 0 : index
      %44 = vector.load %arg9[%c0_28, %c0_29, %c0_30] : memref<1x2x128xf32, #tpu.memory_space<vmem>>, vector<1x2x128xf32>
      tpu.vector_store %arg9[%c0_28, %c0_29, %c0_30], %43 {strides = array<i32>} : memref<1x2x128xf32, #tpu.memory_space<vmem>>, vector<1x2x128xf32>,
    } else {
    }
    return
  }
  func.func @transform_0(%arg0: i32, %arg1: i32) -> (i32, i32) {
    %c0_i32 = arith.constant 0 : i32
    return %arg0, %arg1 : i32, i32
  }
  func.func @transform_1(%arg0: i32, %arg1: i32) -> (i32, i32) {
    %c0_i32 = arith.constant 0 : i32
    %c0_i32_0 = arith.constant 0 : i32
    return %arg1, %c0_i32 : i32, i32
  }
  func.func @transform_2(%arg0: i32, %arg1: i32) -> (i32, i32) {
    %c0_i32 = arith.constant 0 : i32
    %c0_i32_0 = arith.constant 0 : i32
    %c0_i32_1 = arith.constant 0 : i32
    return %c0_i32, %c0_i32_0 : i32, i32
  }
  func.func @transform_3(%arg0: i32, %arg1: i32) -> (i32, i32) {
    %c0_i32 = arith.constant 0 : i32
    %c0_i32_0 = arith.constant 0 : i32
    %c0_i32_1 = arith.constant 0 : i32
    return %c0_i32, %c0_i32_0 : i32, i32
  }
  func.func @transform_4(%arg0: i32, %arg1: i32) -> (i32, i32) {
    %c0_i32 = arith.constant 0 : i32
    %c0_i32_0 = arith.constant 0 : i32
    %c0_i32_1 = arith.constant 0 : i32
    return %c0_i32, %c0_i32_0 : i32, i32
  }
  func.func @transform_5(%arg0: i32, %arg1: i32) -> (i32, i32) {
    %c0_i32 = arith.constant 0 : i32
    %c0_i32_0 = arith.constant 0 : i32
    %c0_i32_1 = arith.constant 0 : i32
    return %c0_i32, %c0_i32_0 : i32, i32
  }
  func.func @transform_6(%arg0: i32, %arg1: i32) -> (i32, i32) {
    %c0_i32 = arith.constant 0 : i32
    %c0_i32_0 = arith.constant 0 : i32
    return %arg0, %c0_i32 : i32, i32
  }
  func.func @transform_7(%arg0: i32, %arg1: i32) -> (i32, i32, i32) {
    %c0_i32 = arith.constant 0 : i32
    %c0_i32_0 = arith.constant 0 : i32
    %c0_i32_1 = arith.constant 0 : i32
    return %arg0, %c0_i32, %c0_i32_0 : i32, i32, i32
  }
}

</mosaic_0001>

<bundles_post_ra>
// kernel: tpu_custom_call.1
= control target key start
LH: loop header
LB: loop body
LE: loop exit
PB: predicated region body
PF: predicated region fallthrough
CT: control target
= control target key end

     0   :  { %13 = vsyncpa [#allocation4], 0  ;;  %s1661_s0 = inlined_call_operand.hbm [shape: bf16[128,128], index: 0, kind: input, shape index: {}]   ;;  %s1662_s1 = inlined_call_operand.hbm [shape: f32[128,128], index: 1, kind: input, shape index: {}]   ;;  %s1663_s2 = inlined_call_operand.hbm [shape: f32[128,128], index: 2, kind: input, shape index: {}]   ;;  %s1664_s3 = inlined_call_operand.vmem [shape: f32[1,128], index: 3, kind: input, shape index: {}]   ;;  %s1665_s4 = inlined_call_operand.hbm [shape: f32[128,128], index: 4, kind: input, shape index: {}]   ;;  %s1666_s5 = inlined_call_operand.vmem [shape: f32[1,128], index: 5, kind: input, shape index: {}]   ;;  %s1667_s6 = inlined_call_operand.hbm [shape: f32[128,128], index: 6, kind: output, shape index: {0}]   ;;  %s1668_s7 = inlined_call_operand.hbm [shape: f32[1,2,128], index: 7, kind: output, shape index: {1}]  }
   0x1   :  { %14 = vsyncpa [#allocation7], 0 }
   0x2   :  { %15 = vsyncpa [#allocation10], 0 }
   0x3   :  { %16 = vsyncpa [#allocation5], 0 }
   0x4   :  { %17 = vsyncpa [#allocation13], 0  ;;  %s1492_s24 = smov [#allocation6]   ;;  %s1350_s28 = scalar_lea.hbm %s1662_s1, 2048 }
   0x5   :  { %s35_s25 = sshll.u32 %s1492_s24, 4  ;;  %p1351_p0 = scmp.ne.s32.totalorder %s1662_s1, %s1350_s28  ;;  %s36_s25 = int_to_ptr.vmem [resolvable:$true] %s35_s25 }
   0x6   :  { %p1354_p1 = scmp.lt.u32.totalorder %s1350_s28, %s1662_s1 }
   0x8   :  { %p1356_p2 = pnand %p1354_p1, %p1351_p0 }
   0xa   :  { %1359 = shalt.err (!%p1356_p2)
}
   0xb   :  { %s1360_s10 = scalar_lea.vmem %s36_s25, 2048  ;;  %p1365_p4 = scmp.lt.s32.totalorder %s36_s25, %s36_s25 }
   0xc   :  { %p1361_p3 = scmp.ne.s32.totalorder %s36_s25, %s1360_s10  ;;  %p1366_p5 = scmp.lt.s32.totalorder %s1360_s10, %s1360_s10 }
   0xe   :  { %p1367_p6 = por %p1366_p5, %p1365_p4 }
  0x10   :  { %p1368_p7 = pnand %p1367_p6, %p1361_p3 }
  0x12   :  { %1371 = shalt.err (!%p1368_p7)
}
  0x13   :  { %s1493_s11 = smov 128   ;;  %s1494_s12 = smov 8  }
  0x14   :  { %41 = dma.hbm_to_vmem [thread:$0]  %s1662_s1, 2048, %s36_s25, [#allocation7], %s1493_s11, %s1493_s11, %s1494_s12  }
  0x15   :  { %s1495_s15 = smov [#allocation3]   ;;  %s1372_s19 = scalar_lea.hbm %s1661_s0, 1024 }
  0x16   :  { %s23_s16 = sshll.u32 %s1495_s15, 4  ;;  %p1373_p8 = scmp.ne.s32.totalorder %s1661_s0, %s1372_s19  ;;  %s24_s16 = int_to_ptr.vmem [resolvable:$true] %s23_s16 }
  0x17   :  { %p1376_p9 = scmp.lt.u32.totalorder %s1372_s19, %s1661_s0 }
  0x19   :  { %p1378_p10 = pnand %p1376_p9, %p1373_p8 }
  0x1b   :  { %1381 = shalt.err (!%p1378_p10)
}
  0x1c   :  { %s1382_s24 = scalar_lea.vmem %s24_s16, 1024  ;;  %p1387_p12 = scmp.lt.s32.totalorder %s24_s16, %s24_s16 }
  0x1d   :  { %p1383_p11 = scmp.ne.s32.totalorder %s24_s16, %s1382_s24  ;;  %p1388_p13 = scmp.lt.s32.totalorder %s1382_s24, %s1382_s24 }
  0x1f   :  { %p1389_p0 = por %p1388_p13, %p1387_p12 }
  0x21   :  { %p1390_p1 = pnand %p1389_p0, %p1383_p11 }
  0x23   :  { %1393 = shalt.err (!%p1390_p1)
}
  0x24   :  { %s1496_s1 = smov 64   ;;  %s1497_s25 = smov 4  }
  0x25   :  { %29 = dma.hbm_to_vmem [thread:$0]  %s1661_s0, 1024, %s24_s16, [#allocation4], %s1496_s1, %s1496_s1, %s1497_s25  }
  0x26   :  { %s1498_s28 = smov [#allocation8]   ;;  %s1499_s30 = smov [#allocation9]  }
  0x27   :  { %s47_s29 = sshll.u32 %s1498_s28, 4  ;;  %s61_s8 = sshll.u32 %s1499_s30, 4  ;;  %s48_s29 = int_to_ptr.vmem [resolvable:$true] %s47_s29  ;;  %s1569_s8 = int_to_ptr.vmem [resolvable:$true] %s61_s8 }
  0x28   :  { %s1394_s13 = scalar_lea.hbm %s1663_s2, 2048 }
  0x29   :  { %p1395_p2 = scmp.ne.s32.totalorder %s1663_s2, %s1394_s13  ;;  %p1398_p3 = scmp.lt.u32.totalorder %s1394_s13, %s1663_s2 }
  0x2b   :  { %p1400_p4 = pnand %p1398_p3, %p1395_p2 }
  0x2d   :  { %1403 = shalt.err (!%p1400_p4)
}
  0x2e   :  { %s1404_s0 = scalar_lea.vmem %s48_s29, 2048  ;;  %p1409_p6 = scmp.lt.s32.totalorder %s48_s29, %s48_s29 }
  0x2f   :  { %p1405_p5 = scmp.ne.s32.totalorder %s48_s29, %s1404_s0  ;;  %p1410_p7 = scmp.lt.s32.totalorder %s1404_s0, %s1404_s0 }
  0x31   :  { %p1411_p8 = por %p1410_p7, %p1409_p6 }
  0x33   :  { %p1412_p9 = pnand %p1411_p8, %p1405_p5 }
  0x35   :  { %1415 = shalt.err (!%p1412_p9)
}
  0x36   :  { %53 = dma.hbm_to_vmem [thread:$0]  %s1663_s2, 2048, %s48_s29, [#allocation7], %s1493_s11, %s1493_s11, %s1494_s12  }
  0x37   :  { %s1416_s22 = scalar_lea.hbm %s1665_s4, 2048 }
  0x38   :  { %p1417_p10 = scmp.ne.s32.totalorder %s1665_s4, %s1416_s22  ;;  %p1420_p11 = scmp.lt.u32.totalorder %s1416_s22, %s1665_s4 }
  0x3a   :  { %p1422_p12 = pnand %p1420_p11, %p1417_p10 }
  0x3c   :  { %1425 = shalt.err (!%p1422_p12)
}
  0x3d   :  { %s1426_s26 = scalar_lea.vmem %s1569_s8, 2048  ;;  %p1431_p0 = scmp.lt.s32.totalorder %s1569_s8, %s1569_s8 }
  0x3e   :  { %p1427_p13 = scmp.ne.s32.totalorder %s1569_s8, %s1426_s26  ;;  %p1432_p1 = scmp.lt.s32.totalorder %s1426_s26, %s1426_s26 }
  0x40   :  { %p1433_p2 = por %p1432_p1, %p1431_p0 }
  0x42   :  { %p1434_p3 = pnand %p1433_p2, %p1427_p13 }
  0x44   :  { %1437 = shalt.err (!%p1434_p3)
}
  0x45   :  { %67 = dma.hbm_to_vmem [thread:$0]  %s1665_s4, 2048, %s1569_s8, [#allocation10], %s1493_s11, %s1493_s11, %s1494_s12  }
  0x46   :  { %1482 = dma.done.wait [#allocation4], 1024  }
  0x47   :  { %1483 = vsyncadd [#allocation4], 4294966272 }
  0x48   :  { %1484 = dma.done.wait [#allocation7], 4096  }
  0x49   :  { %1485 = vsyncadd [#allocation7], 4294963200 }
  0x4a   :  { %1486 = dma.done.wait [#allocation10], 2048  }
  0x4b   :  { %1487 = vsyncadd [#allocation10], 4294965248  ;;  %v150_v0 = vld [vmem:[#allocation6] sm:$0xff]  ;;  %v151_v1 = vld [vmem:[#allocation6 + $0x8] sm:$0xff]  ;;  %vm887_vm0 = vcmask 1040384  }
  0x4c   :  { %v152_v2 = vld [vmem:[#allocation6 + $0x10] sm:$0xff]  ;;  %v1228_v3 = vpack.c.bf16 %v151_v1, %v150_v0  ;;  %v153_v4 = vld [vmem:[#allocation6 + $0x18] sm:$0xff]  ;;  %v154_v6 = vld [vmem:[#allocation6 + $0x20] sm:$0xff] }
  0x4d   :  { %v1232_v5 = vpack.c.bf16 %v153_v4, %v152_v2  ;;  %v155_v7 = vld [vmem:[#allocation6 + $0x28] sm:$0xff]  ;;  %v1606_v9 = vld [vmem:[#allocation3] sm:$0xff]   ;;  %v156_v10 = vld [vmem:[#allocation6 + $0x30] sm:$0xff] }
  0x4e   :  { %1229 = vmatprep.subr.bf16.mxu0 %v1228_v3  ;;  %v1236_v8 = vpack.c.bf16 %v155_v7, %v154_v6  ;;  %v157_v11 = vld [vmem:[#allocation6 + $0x38] sm:$0xff]  ;;  %v927_v12 = vunpack.c.l.bf16 %v1606_v9  ;;  %v362_v13 = vld [vmem:[#allocation8] sm:$0xff]  ;;  %v363_v14 = vld [vmem:[#allocation8 + $0x8] sm:$0xff]  ;;  %v928_v48 = vunpack.c.h.bf16 %v1606_v9 }
  0x4f   :  { %1231 = vmatpush3.bf16.msra.mxu0 %v1228_v3  ;;  %v364_v15 = vld [vmem:[#allocation8 + $0x10] sm:$0xff]  ;;  %v1240_v16 = vpack.c.bf16 %v157_v11, %v156_v10  ;;  %v365_v17 = vld [vmem:[#allocation8 + $0x18] sm:$0xff]  ;;  %v158_v18 = vld [vmem:[#allocation6 + $0x40] sm:$0xff]  ;;  %v1260_v20 = vpack.c.bf16 %v363_v14, %v362_v13 }
  0x50   :  { %1233 = vmatprep.subr.bf16.mxu0 %v1232_v5  ;;  %1092 = vmatprep.mubr.f32.mxu0 %v927_v12  ;;  %v159_v19 = vld [vmem:[#allocation6 + $0x48] sm:$0xff]  ;;  %v1264_v21 = vpack.c.bf16 %v365_v17, %v364_v15  ;;  %v366_v22 = vld [vmem:[#allocation8 + $0x20] sm:$0xff]  ;;  %v160_v25 = vld [vmem:[#allocation6 + $0x50] sm:$0xff] }
  0x51   :  { %v367_v23 = vld [vmem:[#allocation8 + $0x28] sm:$0xff]  ;;  %1261 = vmatprep.subr.bf16.mxu1 %v1260_v20  ;;  %v1244_v24 = vpack.c.bf16 %v159_v19, %v158_v18  ;;  %v161_v26 = vld [vmem:[#allocation6 + $0x58] sm:$0xff]  ;;  %v368_v28 = vld [vmem:[#allocation8 + $0x30] sm:$0xff] }
  0x52   :  { %1263 = vmatpush3.bf16.msra.mxu1 %v1260_v20  ;;  %v1268_v27 = vpack.c.bf16 %v367_v23, %v366_v22  ;;  %v369_v29 = vld [vmem:[#allocation8 + $0x38] sm:$0xff]  ;;  %v1248_v30 = vpack.c.bf16 %v161_v26, %v160_v25  ;;  %v162_v31 = vld [vmem:[#allocation6 + $0x60] sm:$0xff]  ;;  %v163_v32 = vld [vmem:[#allocation6 + $0x68] sm:$0xff] }
  0x53   :  { %1235 = vmatpush3.bf16.msra.mxu0 %v1232_v5  ;;  %1265 = vmatprep.subr.bf16.mxu1 %v1264_v21  ;;  %v1272_v33 = vpack.c.bf16 %v369_v29, %v368_v28  ;;  %v370_v34 = vld [vmem:[#allocation8 + $0x40] sm:$0xff]  ;;  %v371_v35 = vld [vmem:[#allocation8 + $0x48] sm:$0xff]  ;;  %v1252_v36 = vpack.c.bf16 %v163_v32, %v162_v31  ;;  %v164_v37 = vld [vmem:[#allocation6 + $0x70] sm:$0xff] }
  0x54   :  { %1237 = vmatprep.subr.bf16.mxu0 %v1236_v8  ;;  %v165_v38 = vld [vmem:[#allocation6 + $0x78] sm:$0xff]  ;;  %v1276_v39 = vpack.c.bf16 %v371_v35, %v370_v34  ;;  %v372_v40 = vld [vmem:[#allocation8 + $0x50] sm:$0xff]  ;;  %v374_v44 = vld [vmem:[#allocation8 + $0x60] sm:$0xff] }
  0x55   :  { %v373_v41 = vld [vmem:[#allocation8 + $0x58] sm:$0xff]  ;;  %v1256_v42 = vpack.c.bf16 %v165_v38, %v164_v37  ;;  %v375_v45 = vld [vmem:[#allocation8 + $0x68] sm:$0xff]  ;;  %v376_v49 = vld [vmem:[#allocation8 + $0x70] sm:$0xff] }
  0x56   :  { %1267 = vmatpush3.bf16.msra.mxu1 %v1264_v21  ;;  %v1280_v43 = vpack.c.bf16 %v373_v41, %v372_v40  ;;  %v957_v46 = vld [vmem:[#allocation3 + $0x8] sm:$0xff]   ;;  %v1284_v47 = vpack.c.bf16 %v375_v45, %v374_v44  ;;  %v377_v50 = vld [vmem:[#allocation8 + $0x78] sm:$0xff]  ;;  %v958_v52 = vld [vmem:[#allocation3 + $0x10] sm:$0xff]  }
  0x57   :  { %1239 = vmatpush3.bf16.msra.mxu0 %v1236_v8  ;;  %1269 = vmatprep.subr.bf16.mxu1 %v1268_v27  ;;  %v931_v51 = vunpack.c.l.bf16 %v957_v46  ;;  %v1288_v53 = vpack.c.bf16 %v377_v50, %v376_v49  ;;  %v932_v54 = vunpack.c.h.bf16 %v957_v46  ;;  %v935_v55 = vunpack.c.l.bf16 %v958_v52  ;;  %v959_v56 = vld [vmem:[#allocation3 + $0x18] sm:$0xff]   ;;  %v960_v59 = vld [vmem:[#allocation3 + $0x20] sm:$0xff]   ;;  %v961_v62 = vld [vmem:[#allocation3 + $0x28] sm:$0xff]  }
  0x58   :  { %1241 = vmatprep.subr.bf16.mxu0 %v1240_v16  ;;  %v936_v57 = vunpack.c.h.bf16 %v958_v52  ;;  %v939_v58 = vunpack.c.l.bf16 %v959_v56  ;;  %v940_v60 = vunpack.c.h.bf16 %v959_v56  ;;  %v943_v61 = vunpack.c.l.bf16 %v960_v59  ;;  %v962_v1 = vld [vmem:[#allocation3 + $0x30] sm:$0xff]   ;;  %v963_v4 = vld [vmem:[#allocation3 + $0x38] sm:$0xff]   ;;  %v546_v8 = vld [vmem:[#allocation9] sm:$0xff] }
  0x59   :  { %v944_v63 = vunpack.c.h.bf16 %v960_v59  ;;  %v947_v0 = vunpack.c.l.bf16 %v961_v62  ;;  %v948_v2 = vunpack.c.h.bf16 %v961_v62  ;;  %v951_v3 = vunpack.c.l.bf16 %v962_v1  ;;  %v547_v9 = vld [vmem:[#allocation9 + $0x8] sm:$0xff]  ;;  %v548_v10 = vld [vmem:[#allocation9 + $0x10] sm:$0xff]  ;;  %v549_v12 = vld [vmem:[#allocation9 + $0x18] sm:$0xff] }
  0x5a   :  { %1271 = vmatpush3.bf16.msra.mxu1 %v1268_v27  ;;  %v952_v5 = vunpack.c.h.bf16 %v962_v1  ;;  %v955_v6 = vunpack.c.l.bf16 %v963_v4  ;;  %v956_v7 = vunpack.c.h.bf16 %v963_v4  ;;  %v1292_v11 = vpack.c.bf16 %v547_v9, %v546_v8  ;;  %v550_v14 = vld [vmem:[#allocation9 + $0x20] sm:$0xff]  ;;  %v551_v15 = vld [vmem:[#allocation9 + $0x28] sm:$0xff]  ;;  %v552_v17 = vld [vmem:[#allocation9 + $0x30] sm:$0xff] }
  0x5b   :  { %1243 = vmatpush3.bf16.msra.mxu0 %v1240_v16  ;;  %1273 = vmatprep.subr.bf16.mxu1 %v1272_v33  ;;  %v1296_v13 = vpack.c.bf16 %v549_v12, %v548_v10  ;;  %v1300_v16 = vpack.c.bf16 %v551_v15, %v550_v14  ;;  %v553_v18 = vld [vmem:[#allocation9 + $0x38] sm:$0xff]  ;;  %v554_v20 = vld [vmem:[#allocation9 + $0x40] sm:$0xff]  ;;  %v555_v21 = vld [vmem:[#allocation9 + $0x48] sm:$0xff] }
  0x5c   :  { %1245 = vmatprep.subr.bf16.mxu0 %v1244_v24  ;;  %v1304_v19 = vpack.c.bf16 %v553_v18, %v552_v17  ;;  %v1308_v22 = vpack.c.bf16 %v555_v21, %v554_v20  ;;  %v556_v23 = vld [vmem:[#allocation9 + $0x50] sm:$0xff]  ;;  %v558_v26 = vld [vmem:[#allocation9 + $0x60] sm:$0xff]  ;;  %v559_v27 = vld [vmem:[#allocation9 + $0x68] sm:$0xff] }
  0x5d   :  { %v1316_v28 = vpack.c.bf16 %v559_v27, %v558_v26  ;;  %v560_v45 = vld [vmem:[#allocation9 + $0x70] sm:$0xff]  ;;  %v561_v46 = vld [vmem:[#allocation9 + $0x78] sm:$0xff] }
  0x5e   :  { %1275 = vmatpush3.bf16.msra.mxu1 %v1272_v33 }
  0x5f   :  { %1247 = vmatpush3.bf16.msra.mxu0 %v1244_v24  ;;  %1277 = vmatprep.subr.bf16.mxu1 %v1276_v39  ;;  %v557_v24 = vld [vmem:[#allocation9 + $0x58] sm:$0xff] }
  0x60   :  { %1249 = vmatprep.subr.bf16.mxu0 %v1248_v30  ;;  %v1312_v25 = vpack.c.bf16 %v557_v24, %v556_v23 }
  0x62   :  { %1279 = vmatpush3.bf16.msra.mxu1 %v1276_v39 }
  0x63   :  { %1251 = vmatpush3.bf16.msra.mxu0 %v1248_v30  ;;  %1281 = vmatprep.subr.bf16.mxu1 %v1280_v43 }
  0x64   :  { %1253 = vmatprep.subr.bf16.mxu0 %v1252_v36 }
  0x66   :  { %1283 = vmatpush3.bf16.msra.mxu1 %v1280_v43 }
  0x67   :  { %1255 = vmatpush3.bf16.msra.mxu0 %v1252_v36  ;;  %1285 = vmatprep.subr.bf16.mxu1 %v1284_v47 }
  0x68   :  { %1257 = vmatprep.subr.bf16.mxu0 %v1256_v42 }
  0x6a   :  { %1287 = vmatpush3.bf16.msra.mxu1 %v1284_v47  ;;  %v1320_v47 = vpack.c.bf16 %v561_v46, %v560_v45 }
  0x6b   :  { %1259 = vmatpush3.bf16.msra.mxu0 %v1256_v42  ;;  %1289 = vmatprep.subr.bf16.mxu1 %v1288_v53 }
  0x6c   :  { %1293 = vmatprep.subr.bf16.mxu0 %v1292_v11 }
  0x6e   :  { %1093 = vmatmul.mubr.f32.vlgmr.msra.gmra.mrb[0].mxu0 %v928_v48  ;;  %1291 = vmatpush3.bf16.msra.mxu1 %v1288_v53  ;;  %v923_v48 = vld [vmem:[%s1664_s3] ss:$0 sm:$0xff] }
  0x6f   :  { %1095 = vmatprep.mubr.f32.mxu0 %v931_v51  ;;  %1324 = vmatprep.subr.bf16.mxu1 %v1292_v11 }
  0x70   :  { %1295 = vmatpush3.bf16.msra.mxu0 %v1292_v11 }
  0x71   :  { %1297 = vmatprep.subr.bf16.mxu0 %v1296_v13 }
  0x72   :  { %1096 = vmatmul.mubr.f32.gmra.mrb[2].mxu0 %v932_v54 }
  0x73   :  { %1098 = vmatprep.mubr.f32.mxu0 %v935_v55 }
  0x74   :  { %1299 = vmatpush3.bf16.msra.mxu0 %v1296_v13 }
  0x75   :  { %1301 = vmatprep.subr.bf16.mxu0 %v1300_v16 }
  0x76   :  { %1099 = vmatmul.mubr.f32.gmra.mrb[4].mxu0 %v936_v57 }
  0x77   :  { %1101 = vmatprep.mubr.f32.mxu0 %v939_v58 }
  0x78   :  { %1303 = vmatpush3.bf16.msra.mxu0 %v1300_v16 }
  0x79   :  { %1305 = vmatprep.subr.bf16.mxu0 %v1304_v19 }
  0x7a   :  { %1102 = vmatmul.mubr.f32.gmra.mrb[6].mxu0 %v940_v60 }
  0x7b   :  { %1104 = vmatprep.mubr.f32.mxu0 %v943_v61 }
  0x7c   :  { %1307 = vmatpush3.bf16.msra.mxu0 %v1304_v19 }
  0x7d   :  { %1309 = vmatprep.subr.bf16.mxu0 %v1308_v22 }
  0x7e   :  { %1105 = vmatmul.mubr.f32.gmra.mrb[8].mxu0 %v944_v63 }
  0x7f   :  { %1107 = vmatprep.mubr.f32.mxu0 %v947_v0 }
  0x80   :  { %1311 = vmatpush3.bf16.msra.mxu0 %v1308_v22 }
  0x81   :  { %1313 = vmatprep.subr.bf16.mxu0 %v1312_v25 }
  0x82   :  { %1108 = vmatmul.mubr.f32.gmra.mrb[10].mxu0 %v948_v2 }
  0x83   :  { %1110 = vmatprep.mubr.f32.mxu0 %v951_v3 }
  0x84   :  { %1315 = vmatpush3.bf16.msra.mxu0 %v1312_v25 }
  0x85   :  { %1317 = vmatprep.subr.bf16.mxu0 %v1316_v28 }
  0x86   :  { %1111 = vmatmul.mubr.f32.gmra.mrb[12].mxu0 %v952_v5 }
  0x87   :  { %1113 = vmatprep.mubr.f32.mxu0 %v955_v6 }
  0x88   :  { %1319 = vmatpush3.bf16.msra.mxu0 %v1316_v28 }
  0x89   :  { %1321 = vmatprep.subr.bf16.mxu0 %v1320_v47 }
  0x8a   :  { %1114 = vmatmul.mubr.f32.gmra.mrb[14].mxu0 %v956_v7 }
  0x8c   :  { %1323 = vmatpush3.bf16.msra.mxu0 %v1320_v47 }
 0x141   :  { %v1094_v29 = vpop.f32.mrb[0].mxu0 }
 0x142   :  { %v232_v30 = vpop.f32.mrb[1].mxu0 }
 0x143   :  { %1148 = vmatprep.mubr.f32.mxu1 %v232_v30 }
 0x144   :  { %1149 = vmatmul.mubr.f32.vlgmr.msra.gmra.mrb[0].mxu1 %v1094_v29 }
 0x145   :  { %v1097_v31 = vpop.f32.mrb[2].mxu0  ;;  %1332 = vmatpush3.bf16.msra.mxu1 %v1292_v11 }
 0x146   :  { %v242_v32 = vpop.f32.mrb[3].mxu0  ;;  %1325 = vmatprep.subr.bf16.mxu1 %v1296_v13 }
 0x147   :  { %1151 = vmatprep.mubr.f32.mxu1 %v242_v32 }
 0x148   :  { %1152 = vmatmul.mubr.f32.gmra.mrb[2].mxu1 %v1097_v31 }
 0x149   :  { %v1100_v33 = vpop.f32.mrb[4].mxu0  ;;  %1333 = vmatpush3.bf16.msra.mxu1 %v1296_v13 }
 0x14a   :  { %v252_v34 = vpop.f32.mrb[5].mxu0  ;;  %1326 = vmatprep.subr.bf16.mxu1 %v1300_v16 }
 0x14b   :  { %1154 = vmatprep.mubr.f32.mxu1 %v252_v34 }
 0x14c   :  { %1155 = vmatmul.mubr.f32.gmra.mrb[4].mxu1 %v1100_v33  ;;  %v1616_v33 = vld [vmem:[%s1666_s5] ss:$0 sm:$0xff]  ;;  %s1500_s5 = smov [#allocation12]  }
 0x14d   :  { %v1103_v35 = vpop.f32.mrb[6].mxu0  ;;  %1334 = vmatpush3.bf16.msra.mxu1 %v1300_v16  ;;  %s908_s30 = sshll.u32 %s1500_s5, 4  ;;  %s909_s30 = int_to_ptr.vmem [resolvable:$true] %s908_s30 }
 0x14e   :  { %v262_v36 = vpop.f32.mrb[7].mxu0  ;;  %1327 = vmatprep.subr.bf16.mxu1 %v1304_v19  ;;  %s1438_s8 = scalar_lea.vmem %s909_s30, 32  ;;  %p1443_p5 = scmp.lt.s32.totalorder %s909_s30, %s909_s30 }
 0x14f   :  { %1157 = vmatprep.mubr.f32.mxu1 %v262_v36  ;;  %p1439_p4 = scmp.ne.s32.totalorder %s909_s30, %s1438_s8  ;;  %p1444_p6 = scmp.lt.s32.totalorder %s1438_s8, %s1438_s8 }
 0x150   :  { %1158 = vmatmul.mubr.f32.gmra.mrb[6].mxu1 %v1103_v35 }
 0x151   :  { %v1106_v37 = vpop.f32.mrb[8].mxu0  ;;  %1335 = vmatpush3.bf16.msra.mxu1 %v1304_v19  ;;  %p1445_p7 = por %p1444_p6, %p1443_p5 }
 0x152   :  { %v272_v38 = vpop.f32.mrb[9].mxu0  ;;  %1328 = vmatprep.subr.bf16.mxu1 %v1308_v22 }
 0x153   :  { %1160 = vmatprep.mubr.f32.mxu1 %v272_v38  ;;  %p1446_p8 = pnand %p1445_p7, %p1439_p4 }
 0x154   :  { %1161 = vmatmul.mubr.f32.gmra.mrb[8].mxu1 %v1106_v37 }
 0x155   :  { %v1109_v39 = vpop.f32.mrb[10].mxu0  ;;  %1336 = vmatpush3.bf16.msra.mxu1 %v1308_v22 }
 0x156   :  { %v282_v40 = vpop.f32.mrb[11].mxu0  ;;  %1329 = vmatprep.subr.bf16.mxu1 %v1312_v25 }
 0x157   :  { %1163 = vmatprep.mubr.f32.mxu1 %v282_v40 }
 0x158   :  { %1164 = vmatmul.mubr.f32.gmra.mrb[10].mxu1 %v1109_v39 }
 0x159   :  { %v1112_v41 = vpop.f32.mrb[12].mxu0  ;;  %1337 = vmatpush3.bf16.msra.mxu1 %v1312_v25 }
 0x15a   :  { %v292_v42 = vpop.f32.mrb[13].mxu0  ;;  %1330 = vmatprep.subr.bf16.mxu1 %v1316_v28 }
 0x15b   :  { %1166 = vmatprep.mubr.f32.mxu1 %v292_v42 }
 0x15c   :  { %1167 = vmatmul.mubr.f32.gmra.mrb[12].mxu1 %v1112_v41 }
 0x15d   :  { %v1115_v43 = vpop.f32.mrb[14].mxu0  ;;  %1338 = vmatpush3.bf16.msra.mxu1 %v1316_v28 }
 0x15e   :  { %v302_v44 = vpop.f32.mrb[15].mxu0  ;;  %1331 = vmatprep.subr.bf16.mxu1 %v1320_v47 }
 0x15f   :  { %1169 = vmatprep.mubr.f32.mxu1 %v302_v44 }
 0x160   :  { %1170 = vmatmul.mubr.f32.gmra.mrb[14].mxu1 %v1115_v43 }
 0x161   :  { %1339 = vmatpush3.bf16.msra.mxu1 %v1320_v47 }
 0x217   :  { %v1150_v49 = vpop.f32.mrb[0].mxu1 }
 0x218   :  { %v457_v50 = vadd.f32 %v1150_v49, %v923_v48  ;;  %v451_v51 = vpop.f32.mrb[1].mxu1 }
 0x219   :  { %v452_v52 = vadd.f32 %v923_v48, %v451_v51 }
 0x21a   :  { %v531_v55 = vmax.f32 %v457_v50, 0.0 }
 0x21b   :  { %v530_v53 = vmax.f32 %v452_v52, 0.0  ;;  %v1153_v54 = vpop.f32.mrb[2].mxu1 }
 0x21c   :  { %v467_v56 = vadd.f32 %v1153_v54, %v923_v48  ;;  %v461_v57 = vpop.f32.mrb[3].mxu1 }
 0x21d   :  { %v462_v58 = vadd.f32 %v923_v48, %v461_v57  ;;  %1204 = vmatprep.mubr.f32.mxu0 %v530_v53 }
 0x21e   :  { %1205 = vmatmul.mubr.f32.vlgmr.msra.gmra.mrb[16].mxu0 %v531_v55  ;;  %v533_v61 = vmax.f32 %v467_v56, 0.0 }
 0x21f   :  { %v532_v59 = vmax.f32 %v462_v58, 0.0  ;;  %v1156_v60 = vpop.f32.mrb[4].mxu1 }
 0x220   :  { %v477_v62 = vadd.f32 %v1156_v60, %v923_v48  ;;  %v471_v63 = vpop.f32.mrb[5].mxu1 }
 0x221   :  { %v472_v0 = vadd.f32 %v923_v48, %v471_v63  ;;  %1207 = vmatprep.mubr.f32.mxu0 %v532_v59 }
 0x222   :  { %1208 = vmatmul.mubr.f32.gmra.mrb[18].mxu0 %v533_v61  ;;  %v535_v3 = vmax.f32 %v477_v62, 0.0 }
 0x223   :  { %v534_v1 = vmax.f32 %v472_v0, 0.0  ;;  %v1159_v2 = vpop.f32.mrb[6].mxu1 }
 0x224   :  { %v487_v4 = vadd.f32 %v1159_v2, %v923_v48  ;;  %v481_v5 = vpop.f32.mrb[7].mxu1 }
 0x225   :  { %v482_v6 = vadd.f32 %v923_v48, %v481_v5  ;;  %1210 = vmatprep.mubr.f32.mxu0 %v534_v1 }
 0x226   :  { %1211 = vmatmul.mubr.f32.gmra.mrb[20].mxu0 %v535_v3  ;;  %v537_v9 = vmax.f32 %v487_v4, 0.0 }
 0x227   :  { %v536_v7 = vmax.f32 %v482_v6, 0.0  ;;  %v1162_v8 = vpop.f32.mrb[8].mxu1 }
 0x228   :  { %v497_v10 = vadd.f32 %v1162_v8, %v923_v48  ;;  %v491_v11 = vpop.f32.mrb[9].mxu1 }
 0x229   :  { %v492_v12 = vadd.f32 %v923_v48, %v491_v11  ;;  %1213 = vmatprep.mubr.f32.mxu0 %v536_v7 }
 0x22a   :  { %1214 = vmatmul.mubr.f32.gmra.mrb[22].mxu0 %v537_v9  ;;  %v539_v15 = vmax.f32 %v497_v10, 0.0 }
 0x22b   :  { %v538_v13 = vmax.f32 %v492_v12, 0.0  ;;  %v1165_v14 = vpop.f32.mrb[10].mxu1 }
 0x22c   :  { %v507_v16 = vadd.f32 %v1165_v14, %v923_v48  ;;  %v501_v17 = vpop.f32.mrb[11].mxu1 }
 0x22d   :  { %v502_v18 = vadd.f32 %v923_v48, %v501_v17  ;;  %1216 = vmatprep.mubr.f32.mxu1 %v538_v13 }
 0x22e   :  { %1217 = vmatmul.mubr.f32.vlgmr.msra.gmra.mrb[16].mxu1 %v539_v15  ;;  %v541_v21 = vmax.f32 %v507_v16, 0.0 }
 0x22f   :  { %v540_v19 = vmax.f32 %v502_v18, 0.0  ;;  %v1168_v20 = vpop.f32.mrb[12].mxu1 }
 0x230   :  { %v517_v22 = vadd.f32 %v1168_v20, %v923_v48  ;;  %v511_v23 = vpop.f32.mrb[13].mxu1 }
 0x231   :  { %v512_v24 = vadd.f32 %v923_v48, %v511_v23  ;;  %1219 = vmatprep.mubr.f32.mxu1 %v540_v19 }
 0x232   :  { %1220 = vmatmul.mubr.f32.gmra.mrb[18].mxu1 %v541_v21  ;;  %v543_v27 = vmax.f32 %v517_v22, 0.0 }
 0x233   :  { %v542_v25 = vmax.f32 %v512_v24, 0.0  ;;  %v1171_v26 = vpop.f32.mrb[14].mxu1 }
 0x234   :  { %v527_v28 = vadd.f32 %v1171_v26, %v923_v48  ;;  %v521_v29 = vpop.f32.mrb[15].mxu1 }
 0x235   :  { %v522_v30 = vadd.f32 %v923_v48, %v521_v29  ;;  %1222 = vmatprep.mubr.f32.mxu1 %v542_v25 }
 0x236   :  { %1223 = vmatmul.mubr.f32.gmra.mrb[20].mxu1 %v543_v27  ;;  %v545_v32 = vmax.f32 %v527_v28, 0.0 }
 0x237   :  { %v544_v31 = vmax.f32 %v522_v30, 0.0 }
 0x239   :  { %1225 = vmatprep.mubr.f32.mxu1 %v544_v31 }
 0x23a   :  { %1226 = vmatmul.mubr.f32.gmra.mrb[22].mxu1 %v545_v32 }
 0x2f1   :  { %v1206_v34 = vpop.f32.mrb[16].mxu0 }
 0x2f2   :  { %v641_v35 = vadd.f32 %v1206_v34, %v1616_v33  ;;  %v635_v36 = vpop.f32.mrb[17].mxu0 }
 0x2f3   :  { %v636_v37 = vadd.f32 %v1616_v33, %v635_v36 }
 0x2f4   :  { %715 = vst [vmem:[#allocation11 + $0x8] sm:$0xff] %v641_v35  ;;  %v851_v38 = vmul.f32 %v641_v35, %v641_v35 }
 0x2f5   :  { %714 = vst [vmem:[#allocation11] sm:$0xff] %v636_v37  ;;  %v829_v39 = vadd.f32 %v641_v35, %v636_v37  ;;  %v850_v40 = vmul.f32 %v636_v37, %v636_v37  ;;  %v1209_v41 = vpop.f32.mrb[18].mxu0 }
 0x2f6   :  { %v651_v42 = vadd.f32 %v1209_v41, %v1616_v33  ;;  %v645_v43 = vpop.f32.mrb[19].mxu0 }
 0x2f7   :  { %v844_v44 = vrot.slane %v829_v39, 4  ;;  %v866_v45 = vadd.f32 %v851_v38, %v850_v40  ;;  %v646_v46 = vadd.f32 %v1616_v33, %v645_v43 }
 0x2f8   :  { %717 = vst [vmem:[#allocation11 + $0x18] sm:$0xff] %v651_v42 }
 0x2f9   :  { %v845_v47 = vadd.f32 %v844_v44, %v829_v39  ;;  %v881_v48 = vrot.slane %v866_v45, 4  ;;  %716 = vst [vmem:[#allocation11 + $0x10] sm:$0xff] %v646_v46  ;;  %v1212_v49 = vpop.f32.mrb[20].mxu0 }
 0x2fa   :  { %v661_v50 = vadd.f32 %v1212_v49, %v1616_v33  ;;  %v655_v51 = vpop.f32.mrb[21].mxu0 }
 0x2fb   :  { %v846_v52 = vrot.slane %v845_v47, 2  ;;  %v882_v53 = vadd.f32 %v881_v48, %v866_v45  ;;  %v656_v54 = vadd.f32 %v1616_v33, %v655_v51 }
 0x2fc   :  { %719 = vst [vmem:[#allocation11 + $0x28] sm:$0xff] %v661_v50 }
 0x2fd   :  { %v847_v55 = vadd.f32 %v846_v52, %v845_v47  ;;  %v883_v56 = vrot.slane %v882_v53, 2  ;;  %718 = vst [vmem:[#allocation11 + $0x20] sm:$0xff] %v656_v54  ;;  %v1215_v57 = vpop.f32.mrb[22].mxu0 }
 0x2fe   :  { %v671_v58 = vadd.f32 %v1215_v57, %v1616_v33  ;;  %v665_v59 = vpop.f32.mrb[23].mxu0 }
 0x2ff   :  { %v666_v60 = vadd.f32 %v1616_v33, %v665_v59  ;;  %v848_v61 = vrot.slane %v847_v55, 1  ;;  %v884_v62 = vadd.f32 %v883_v56, %v882_v53 }
 0x300   :  { %721 = vst [vmem:[#allocation11 + $0x38] sm:$0xff] %v671_v58 }
 0x301   :  { %720 = vst [vmem:[#allocation11 + $0x30] sm:$0xff] %v666_v60  ;;  %v1218_v63 = vpop.f32.mrb[16].mxu1  ;;  %v885_v0 = vrot.slane %v884_v62, 1  ;;  %v849_v4 = vadd.f32 %v848_v61, %v847_v55 }
 0x302   :  { %v681_v1 = vadd.f32 %v1218_v63, %v1616_v33  ;;  %v675_v2 = vpop.f32.mrb[17].mxu1 }
 0x303   :  { %v676_v3 = vadd.f32 %v1616_v33, %v675_v2  ;;  %v886_v5 = vadd.f32 %v885_v0, %v884_v62 }
 0x304   :  { %723 = vst [vmem:[#allocation11 + $0x48] sm:$0xff] %v681_v1 }
 0x305   :  { %722 = vst [vmem:[#allocation11 + $0x40] sm:$0xff] %v676_v3  ;;  %v1221_v6 = vpop.f32.mrb[18].mxu1  ;;  %v888_v7 = vsel %vm887_vm0, %v849_v4, %v886_v5 }
 0x306   :  { %v691_v8 = vadd.f32 %v1221_v6, %v1616_v33  ;;  %v685_v9 = vpop.f32.mrb[19].mxu1  ;;  %889 = vst [vmem:[#allocation12] sm:$0x3] %v888_v7 }
 0x307   :  { %v686_v10 = vadd.f32 %v1616_v33, %v685_v9 }
 0x308   :  { %1449 = shalt.err (!%p1446_p8)
}
 0x309   :  { %s1450_s13 = scalar_lea.hbm %s1668_s7, 32 }
 0x30a   :  { %p1451_p9 = scmp.ne.s32.totalorder %s1668_s7, %s1450_s13  ;;  %p1454_p10 = scmp.lt.u32.totalorder %s1450_s13, %s1668_s7 }
 0x30c   :  { %p1456_p11 = pnand %p1454_p10, %p1451_p9 }
 0x30e   :  { %1459 = shalt.err (!%p1456_p11)
}
 0x30f   :  { %911 = dma.vmem_to_hbm [thread:$0]  %s909_s30, 32, %s1668_s7, [#allocation13]   ;;  %725 = vst [vmem:[#allocation11 + $0x58] sm:$0xff] %v691_v8  ;;  %724 = vst [vmem:[#allocation11 + $0x50] sm:$0xff] %v686_v10  ;;  %v1224_v11 = vpop.f32.mrb[20].mxu1 }
 0x310   :  { %v701_v12 = vadd.f32 %v1224_v11, %v1616_v33  ;;  %v695_v13 = vpop.f32.mrb[21].mxu1  ;;  %s1501_s19 = smov [#allocation11]  }
 0x311   :  { %v696_v14 = vadd.f32 %v1616_v33, %v695_v13  ;;  %s895_s20 = sshll.u32 %s1501_s19, 4  ;;  %v1227_v15 = vpop.f32.mrb[22].mxu1  ;;  %s896_s20 = int_to_ptr.vmem [resolvable:$true] %s895_s20 }
 0x312   :  { %727 = vst [vmem:[#allocation11 + $0x68] sm:$0xff] %v701_v12  ;;  %v711_v16 = vadd.f32 %v1227_v15, %v1616_v33  ;;  %v705_v17 = vpop.f32.mrb[23].mxu1  ;;  %s1460_s7 = scalar_lea.vmem %s896_s20, 2048  ;;  %p1465_p13 = scmp.lt.s32.totalorder %s896_s20, %s896_s20 }
 0x313   :  { %726 = vst [vmem:[#allocation11 + $0x60] sm:$0xff] %v696_v14  ;;  %v706_v18 = vadd.f32 %v1616_v33, %v705_v17  ;;  %p1461_p12 = scmp.ne.s32.totalorder %s896_s20, %s1460_s7  ;;  %p1466_p0 = scmp.lt.s32.totalorder %s1460_s7, %s1460_s7 }
 0x314   :  { %729 = vst [vmem:[#allocation11 + $0x78] sm:$0xff] %v711_v16 }
 0x315   :  { %728 = vst [vmem:[#allocation11 + $0x70] sm:$0xff] %v706_v18  ;;  %p1467_p1 = por %p1466_p0, %p1465_p13 }
 0x317   :  { %p1468_p2 = pnand %p1467_p1, %p1461_p12 }
 0x319   :  { %1471 = shalt.err (!%p1468_p2)
}
 0x31a   :  { %s1472_s23 = scalar_lea.hbm %s1667_s6, 2048 }
 0x31b   :  { %p1473_p3 = scmp.ne.s32.totalorder %s1667_s6, %s1472_s23  ;;  %p1476_p4 = scmp.lt.u32.totalorder %s1472_s23, %s1667_s6 }
 0x31d   :  { %p1478_p5 = pnand %p1476_p4, %p1473_p3 }
 0x31f   :  { %1481 = shalt.err (!%p1478_p5)
}
 0x320   :  { %901 = dma.vmem_to_hbm [thread:$0]  %s896_s20, 2048, %s1667_s6, [#allocation5], %s1493_s11, %s1493_s11, %s1494_s12  }
 0x321   :  { %1488 = dma.done.wait [#allocation5], 2048  }
 0x322   :  { %1489 = vsyncadd [#allocation5], 4294965248 }
 0x323   :  { %1490 = dma.done.wait [#allocation13], 32  }
 0x324   :  { %1491 = vsyncadd [#allocation13], 4294967264 }
 0x325   :  { %918 = vsyncpa [#allocation4], 1 }
 0x326   :  { %919 = vsyncpa [#allocation7], 1 }
 0x327   :  { %920 = vsyncpa [#allocation10], 1 }
 0x328   :  { %921 = vsyncpa [#allocation5], 1 }
 0x329   :  { %922 = vsyncpa [#allocation13], 1 }

</bundles_post_ra>
